<compile_context>
chip_gen: v5e
topology: v5e:2x2
jax: 0.10.0
libtpu: 0.0.40
codegen_flags: <defaults>
</compile_context>

<pallas_src>
import jax
import jax.numpy as jnp
from jax.experimental import pallas as pl
from jax.experimental.pallas import tpu as pltpu

EPS = 1e-5


def _layernorm_kernel(x_ref, w_ref, b_ref, o_ref):
    # x_ref: (tile_b, c, tile_hw)   w_ref/b_ref: (1, c, 1)
    x = x_ref[...].astype(jnp.float32)
    c = x.shape[1]
    inv_c = jnp.float32(1.0 / c)

    # two-pass mean / biased variance over the channel (sublane) axis
    mu = jnp.sum(x, axis=1, keepdims=True) * inv_c
    xc = x - mu
    var = jnp.sum(xc * xc, axis=1, keepdims=True) * inv_c  # unbiased=False
    inv = jax.lax.rsqrt(var + jnp.float32(EPS))

    w = w_ref[...].astype(jnp.float32)   # (1, c, 1), broadcast over lanes
    b = b_ref[...].astype(jnp.float32)
    o_ref[...] = (xc * inv * w + b).astype(o_ref.dtype)


def _round_up(x, m):
    return (x + m - 1) // m * m


def _tpu_budgets():
    """(target input-block bytes, vmem_limit_bytes), generation aware."""
    try:
        vmem = pltpu.get_tpu_info().vmem_capacity_bytes
    except Exception:
        vmem = 64 * 1024 * 1024  # conservative fallback (assume v7x-sized VMEM)
    if vmem <= 64 * 1024 * 1024:
        # v7x: 64 MiB per TensorCore.  2 MiB blocks already sit near the
        # HBM roofline; leaves room for double-buffered in/out + f32 temps.
        return 2 * 1024 * 1024, 32 * 1024 * 1024
    # v5e / v6e: 128 MiB physical VMEM; 4 MiB blocks, explicit 64 MiB limit
    # (v5e's default scoped limit is only 16 MiB, so the override matters).
    return 4 * 1024 * 1024, 64 * 1024 * 1024


def _choose_tiling(b, c, hw, dtype, target_bytes):
    itemsize = jnp.dtype(dtype).itemsize
    sublane_pack = max(8, 32 // itemsize)       # 8 (f32), 16 (bf16), 32 (i8)
    c_pad = _round_up(c, sublane_pack)          # real sublane footprint of c
    hw_lanes = _round_up(hw, 128)

    # Largest multiple-of-128 lane width that keeps one block <= target_bytes
    # (no divisor search -> no 128-lane-tile cliff on awkward H*W).
    max_lanes = max(128, (target_bytes // (c_pad * itemsize)) // 128 * 128)
    tile_hw = min(hw_lanes, max_lanes)

    # Block multiple batch rows per grid step to amortize per-step overhead
    # on small images (normalization is per-(batch, pixel), so this is legal).
    row_bytes = c_pad * tile_hw * itemsize
    tile_b = max(1, min(b, target_bytes // max(1, row_bytes)))

    # v7x megacore: keep >= 2 grid steps along a "parallel" axis when possible.
    if pl.cdiv(hw, tile_hw) == 1:
        if b >= 2:
            tile_b = min(tile_b, max(1, b // 2))
        elif tile_hw >= 256:
            tile_hw = _round_up(tile_hw // 2, 128)

    grid = (pl.cdiv(b, tile_b), pl.cdiv(hw, tile_hw))
    return tile_b, tile_hw, grid


def layernorm3d(x, weight, bias):
    """x: (b, c, h, w) NCHW.  weight/bias: (c,).  Returns NCHW."""
    b, c, h, w = x.shape
    hw = h * w

    # NCHW -> (b, c, h*w): contiguous reshape, no transpose / pad / extra HBM pass.
    x3 = x.reshape(b, c, hw)

    target_bytes, vmem_limit = _tpu_budgets()
    tile_b, tile_hw, grid = _choose_tiling(b, c, hw, x.dtype, target_bytes)

    w3 = weight.reshape(1, c, 1)
    b3 = bias.reshape(1, c, 1)

    out = pl.pallas_call(
        _layernorm_kernel,
        out_shape=jax.ShapeDtypeStruct((b, c, hw), x.dtype),
        grid_spec=pltpu.PrefetchScalarGridSpec(
            num_scalar_prefetch=0,
            grid=grid,
            in_specs=[
                pl.BlockSpec((tile_b, c, tile_hw), lambda i, j: (i, 0, j)),
                pl.BlockSpec((1, c, 1), lambda i, j: (0, 0, 0)),
                pl.BlockSpec((1, c, 1), lambda i, j: (0, 0, 0)),
            ],
            out_specs=pl.BlockSpec((tile_b, c, tile_hw), lambda i, j: (i, 0, j)),
        ),
        compiler_params=pltpu.CompilerParams(
            dimension_semantics=("parallel", "parallel"),
            vmem_limit_bytes=vmem_limit,
        ),
    )(x3, w3, b3)

    return out.reshape(b, c, h, w)


def _reference(x, weight, bias):
    # pure-JAX reference mirroring the PyTorch module
    b, c, h, w = x.shape
    x3 = jnp.transpose(x, (0, 2, 3, 1)).reshape(b, h * w, c)
    mu = jnp.mean(x3, axis=-1, keepdims=True)
    var = jnp.mean((x3 - mu) ** 2, axis=-1, keepdims=True)
    y = (x3 - mu) / jnp.sqrt(var + EPS) * weight + bias
    return jnp.transpose(y.reshape(b, h, w, c), (0, 3, 1, 2))


if __name__ == "__main__":
    key = jax.random.PRNGKey(0)

    # main test: matches the module's intended small shape
    b, c, h, w = 2, 4, 16, 16
    x = jax.random.normal(key, (b, c, h, w), dtype=jnp.float32)

    # deterministic parameter init, matching WithBias_LayerNorm.__init__
    weight = jnp.ones((c,), dtype=jnp.float32)
    bias = jnp.zeros((c,), dtype=jnp.float32)

    out = layernorm3d(x, weight, bias)
    out = jax.block_until_ready(out)
    ref = _reference(x, weight, bias)
    assert out.shape == (b, c, h, w)
    assert jnp.allclose(out, ref, atol=1e-5, rtol=1e-5), "mismatch vs reference"

    # ragged-H*W test: exercises the cdiv grid / partial last block
    b2, c2, h2, w2 = 1, 4, 5, 7
    x2 = jax.random.normal(jax.random.PRNGKey(1), (b2, c2, h2, w2), dtype=jnp.float32)
    weight2 = jnp.ones((c2,), dtype=jnp.float32)
    bias2 = jnp.zeros((c2,), dtype=jnp.float32)
    out2 = jax.block_until_ready(layernorm3d(x2, weight2, bias2))
    ref2 = _reference(x2, weight2, bias2)
    assert jnp.allclose(out2, ref2, atol=1e-5, rtol=1e-5), "ragged mismatch vs reference"

    print("KERNEL_OK")
</pallas_src>

<mosaic_0001>
module attributes {stable_mosaic.version = 11 : i64} {
  func.func @_layernorm_kernel(%arg0: i32, %arg1: i32, %arg2: memref<1x4x256xf32, #tpu.memory_space<vmem>>, %arg3: memref<1x4x1xf32, #tpu.memory_space<vmem>>, %arg4: memref<1x4x1xf32, #tpu.memory_space<vmem>>, %arg5: memref<1x4x256xf32, #tpu.memory_space<vmem>>) attributes {dimension_semantics = [#tpu.dimension_semantics<parallel>, #tpu.dimension_semantics<parallel>], iteration_bounds = array<i64: 2, 1>, scalar_prefetch = 0 : i64, scratch_operands = 0 : i64, tpu.core_type = #tpu.core_type<tc>, window_params = [{transform_indices = @transform_0, window_bounds = array<i64: 1, 4, 256>}, {pipeline_mode = #tpu.pipeline_mode<synchronous>, transform_indices = @transform_1, window_bounds = array<i64: 1, 4, 1>}, {pipeline_mode = #tpu.pipeline_mode<synchronous>, transform_indices = @transform_2, window_bounds = array<i64: 1, 4, 1>}, {transform_indices = @transform_3, window_bounds = array<i64: 1, 4, 256>}]} {
    %c0 = arith.constant 0 : index
    %c0_0 = arith.constant 0 : index
    %c0_1 = arith.constant 0 : index
    %0 = vector.load %arg2[%c0, %c0_0, %c0_1] : memref<1x4x256xf32, #tpu.memory_space<vmem>>, vector<1x4x256xf32>
    %cst = arith.constant dense<0.000000e+00> : vector<1x256xf32>
    %1 = vector.multi_reduction <add>, %0, %cst [1] : vector<1x4x256xf32> to vector<1x256xf32>
    %2 = vector.shape_cast %1 : vector<1x256xf32> to vector<1x1x256xf32>
    %cst_2 = arith.constant 2.500000e-01 : f32
    %3 = vector.broadcast %cst_2 : f32 to vector<1x1x256xf32>
    %4 = arith.mulf %2, %3 : vector<1x1x256xf32>
    %5 = vector.broadcast %4 : vector<1x1x256xf32> to vector<1x4x256xf32>
    %6 = arith.subf %0, %5 : vector<1x4x256xf32>
    %7 = arith.mulf %6, %6 : vector<1x4x256xf32>
    %cst_3 = arith.constant dense<0.000000e+00> : vector<1x256xf32>
    %8 = vector.multi_reduction <add>, %7, %cst_3 [1] : vector<1x4x256xf32> to vector<1x256xf32>
    %9 = vector.shape_cast %8 : vector<1x256xf32> to vector<1x1x256xf32>
    %cst_4 = arith.constant 2.500000e-01 : f32
    %10 = vector.broadcast %cst_4 : f32 to vector<1x1x256xf32>
    %11 = arith.mulf %9, %10 : vector<1x1x256xf32>
    %cst_5 = arith.constant 9.99999974E-6 : f32
    %12 = vector.broadcast %cst_5 : f32 to vector<1x1x256xf32>
    %13 = arith.addf %11, %12 : vector<1x1x256xf32>
    %14 = math.rsqrt %13 : vector<1x1x256xf32>
    %c0_6 = arith.constant 0 : index
    %c0_7 = arith.constant 0 : index
    %c0_8 = arith.constant 0 : index
    %15 = vector.load %arg3[%c0_6, %c0_7, %c0_8] : memref<1x4x1xf32, #tpu.memory_space<vmem>>, vector<1x4x1xf32>
    %c0_9 = arith.constant 0 : index
    %c0_10 = arith.constant 0 : index
    %c0_11 = arith.constant 0 : index
    %16 = vector.load %arg4[%c0_9, %c0_10, %c0_11] : memref<1x4x1xf32, #tpu.memory_space<vmem>>, vector<1x4x1xf32>
    %17 = vector.broadcast %14 : vector<1x1x256xf32> to vector<1x4x256xf32>
    %18 = arith.mulf %6, %17 : vector<1x4x256xf32>
    %19 = vector.broadcast %15 : vector<1x4x1xf32> to vector<1x4x256xf32>
    %20 = arith.mulf %18, %19 : vector<1x4x256xf32>
    %21 = vector.broadcast %16 : vector<1x4x1xf32> to vector<1x4x256xf32>
    %22 = arith.addf %20, %21 : vector<1x4x256xf32>
    %c0_12 = arith.constant 0 : index
    %c0_13 = arith.constant 0 : index
    %c0_14 = arith.constant 0 : index
    %23 = vector.load %arg5[%c0_12, %c0_13, %c0_14] : memref<1x4x256xf32, #tpu.memory_space<vmem>>, vector<1x4x256xf32>
    tpu.vector_store %arg5[%c0_12, %c0_13, %c0_14], %22 {strides = array<i32>} : memref<1x4x256xf32, #tpu.memory_space<vmem>>, vector<1x4x256xf32>,
    return
  }
  func.func @transform_0(%arg0: i32, %arg1: i32) -> (i32, i32, i32) {
    %c0_i32 = arith.constant 0 : i32
    %c0_i32_0 = arith.constant 0 : i32
    return %arg0, %c0_i32, %arg1 : i32, i32, i32
  }
  func.func @transform_1(%arg0: i32, %arg1: i32) -> (i32, i32, i32) {
    %c0_i32 = arith.constant 0 : i32
    %c0_i32_0 = arith.constant 0 : i32
    %c0_i32_1 = arith.constant 0 : i32
    %c0_i32_2 = arith.constant 0 : i32
    return %c0_i32, %c0_i32_0, %c0_i32_1 : i32, i32, i32
  }
  func.func @transform_2(%arg0: i32, %arg1: i32) -> (i32, i32, i32) {
    %c0_i32 = arith.constant 0 : i32
    %c0_i32_0 = arith.constant 0 : i32
    %c0_i32_1 = arith.constant 0 : i32
    %c0_i32_2 = arith.constant 0 : i32
    return %c0_i32, %c0_i32_0, %c0_i32_1 : i32, i32, i32
  }
  func.func @transform_3(%arg0: i32, %arg1: i32) -> (i32, i32, i32) {
    %c0_i32 = arith.constant 0 : i32
    %c0_i32_0 = arith.constant 0 : i32
    return %arg0, %c0_i32, %arg1 : i32, i32, i32
  }
}

</mosaic_0001>

<bundles_post_ra>
// kernel: tpu_custom_call.1
= control target key start
LH: loop header
LB: loop body
LE: loop exit
PB: predicated region body
PF: predicated region fallthrough
CT: control target
= control target key end

     0   :  { %8 = vsyncpa [#allocation3], 0  ;;  %s774_s0 = inlined_call_operand.hbm [shape: f32[2,4,256], index: 0, kind: input, shape index: {}]   ;;  %s775_s1 = inlined_call_operand.vmem [shape: f32[1,4,1], index: 1, kind: input, shape index: {}]   ;;  %s776_s2 = inlined_call_operand.vmem [shape: f32[1,4,1], index: 2, kind: input, shape index: {}]   ;;  %s777_s3 = inlined_call_operand.hbm [shape: f32[2,4,256], index: 3, kind: output, shape index: {}]  }
   0x1   :  { %10 = vsyncpa [#allocation3 + $0x1], 0 }
   0x2   :  { %11 = vsyncpa [#allocation4], 0 }
   0x3   :  { %13 = vsyncpa [#allocation4 + $0x1], 0  ;;  %s638_s12 = smov 0   ;;  %s640_s13 = smov 0  }
   0x4   :  { %s642_s14 = smov 0   ;;  %s644_s15 = smov 0  }
   0x5   :  { %s646_s16 = smov 0   ;;  %s648_s17 = smov 0  }
   0x6 LB: > { %s416_s18 = sadd.s32 4294967295, %s614_s17   ;;  %s417_s19 = sadd.s32 4294967294, %s614_s17   ;;  %s614_s17 = sphi %s648_s17, %s19_s17   ;;  %s610_s16 = sphi %s646_s16, %s786_s16   ;;  %s606_s15 = sphi %s644_s15, %s785_s15   ;;  %s602_s14 = sphi %s642_s14, %s784_s14   ;;  %s598_s13 = sphi %s640_s13, %s783_s13   ;;  %s594_s12 = sphi %s638_s12, %s782_s12  }
   0x7   : > { %s31_s20 = sadd.s32 1, %s610_s16  ;;  %s40_s21 = sadd.s32 1, %s602_s14 }
   0x8   : > { %p33_p0 = scmp.ge.s32.totalorder %s31_s20, 2  ;;  %p47_p1 = scmp.ne.s32.totalorder %s602_s14, %s598_s13 }
   0x9   : > { %p48_p2 = scmp.eq.s32.totalorder %s614_s17, 0  ;;  %p53_p3 = scmp.ne.s32.totalorder %s598_s13, %s594_s12 }
   0xa   : > { %s788_s20 = smov (%p33_p0, %s31_s20), 0  ;;  %p54_p5 = scmp.eq.s32.totalorder %s416_s18, 0 }
   0xb   : > { %p679_p4 = por %p48_p2, %p47_p1  ;;  %s35_s23 = ssub.s32 %s610_s16, %s788_s20 }
   0xc   : > { %p121_p6 = scmp.eq.s32.totalorder %s416_s18, 1  ;;  %p38_p7 = scmp.eq.s32.totalorder %s35_s23, 0 }
   0xd   : > { %p685_p8 = por %p54_p5, %p53_p3  ;;  %p127_p10 = scmp.eq.s32.totalorder %s417_s19, 1 }
   0xe   : > { %p689_p9 = por %p121_p6, %p47_p1  ;;  %p419_p12 = scmp.ge.s32.totalorder %s614_s17, 2 }
   0xf   : > { %s694_s26 = scalar_select %p38_p7, %s602_s14, %s40_s21  }
  0x10   : > { %p696_p11 = por %p127_p10, %p53_p3  ;;  %p445_p13 = scmp.lt.s32.totalorder %s614_s17, 2 }
  0x11   : > { %s153_s28 = sand.u32 1, %s602_s14   ;;  %s431_s30 = sshll.u32 %s610_s16, 3 }
  0x12   : > { %s420_s29 = sshll.u32 %s153_s28, 3  ;;  %s164_s6 = scalar_lea.hbm %s774_s0, %s431_s30 }
  0x13   : > { %s157_s7 = scalar_lea.vmem [#allocation2], %s420_s29  ;;  %s166_s9 = sshll.u32 %s164_s6, 4  ;;  %s167_s9 = int_to_ptr.hbm [resolvable:$true] %s166_s9 }
  0x14   : > { %s168_s8 = sshll.u32 %s157_s7, 4  ;;  %p438_p0 = pnand %p445_p13, %p679_p4  ;;  %s169_s8 = int_to_ptr.vmem [resolvable:$true] %s168_s8 }
  0x15   : > { %p423_p1 = scmp.ge.s32.totalorder %s614_s17, 1  ;;  %p173_p2 = scmp.lt.s32.totalorder %s614_s17, 3 }
  0x16   : > { %s154_s10 = scalar_lea.sflag [#allocation3], %s153_s28 }
  0x17   : > { %440 = dma.hbm_to_vmem [thread:$0]  (!%p438_p0), %s167_s9, 128, %s169_s8, %s154_s10  }
  0x18   : > { %p174_p3 = pnand %p423_p1, %p173_p2 }
  0x19   : > { %s712_s11 = sand.u32 (!%p174_p3), 1, %s598_s13  }
  0x1a   : > { %177 = sbr.rel (%p174_p3) target bundleno = 164 (0xa4), region = 32  ;;  %s424_s18 = sshll.u32 (!%p174_p3), %s712_s11, 3 }
  0x1b   : > { %s180_s19 = scalar_lea.sflag (!%p174_p3), [#allocation3], %s712_s11  ;;  %s183_s21 = scalar_lea.vmem (!%p174_p3), [#allocation2], %s424_s18 }
  0x1f   : > { %585 = dma.done.wait (%p685_p8), %s180_s19, 128  }
  0x20   : > { %587 = vsyncadd (%p685_p8), %s180_s19, 4294967168  ;;  %v616_v0 = vmov 0   ;;  %v284_v1 = vld [vmem:[%s775_s1] sm:$0xf]  ;;  %v209_v3 = vld [vmem:[%s183_s21] sm:$0xff]  ;;  %vm216_vm0 = vcmask 1043456  }
  0x21   : > { %497 = vset.pattern.permute.xlu0 %v616_v0  ;;  %v285_v2 = vld [vmem:[%s776_s2] sm:$0xf]  ;;  %211 = vst [vmem:[#allocation1] ss:$2 sm:$0xff] %v209_v3  ;;  %v617_v59 = vmov 839922192  }
  0x22   : > { %294 = vperm.xlu0 %497, %v284_v1   ;;  %v297_v60 = vunpack.c.l.s4 %v617_v59  ;;  %s432_s24 = sshll.u32 %s606_s15, 3  ;;  %s206_s6 = scalar_lea.vmem [#allocation5], %s424_s18 }
  0x23   : > { %s327_s5 = scalar_lea.hbm %s777_s3, %s432_s24  ;;  %s329_s7 = sshll.u32 %s206_s6, 4  ;;  %s330_s7 = int_to_ptr.vmem [resolvable:$true] %s329_s7 }
  0x24   : > { %v298_v0 = vunpack.c.0.s8 %v297_v60  ;;  %s331_s8 = sshll.u32 %s327_s5, 4  ;;  %s314_s9 = scalar_lea.sflag [#allocation4], %s712_s11  ;;  %s332_s8 = int_to_ptr.hbm [resolvable:$true] %s331_s8 }
  0x25   : > { %s546_s15 = sshra.s32 %s332_s8, 4  ;;  %s552_s18 = scalar_lea.hbm %s777_s3, 16  ;;  %s547_s15 = int_to_ptr.hbm [resolvable:$true] %s546_s15 }
  0x26   : > { %s548_s10 = scalar_lea.hbm %s547_s15, 8  ;;  %p553_p7 = scmp.lt.s32.totalorder %s547_s15, %s777_s3 }
  0x27   : > { %p549_p4 = scmp.ne.s32.totalorder %s547_s15, %s548_s10  ;;  %p554_p8 = scmp.lt.s32.totalorder %s552_s18, %s548_s10 }
  0x28   : > { %v213_v4 = vld.sshfl [vmem:[#allocation1 + $0x8] sm:$0xff pattern:$0x75316420]  ;;  %v212_v6 = vld.sshfl [vmem:[#allocation1] sm:$0xff pattern:$0x75316420] }
  0x29   : > { %v224_v5 = vsel %vm216_vm0, %v213_v4, 0.0  ;;  %v217_v8 = vsel %vm216_vm0, %v212_v6, 0.0  ;;  %p550_p5 = pnand %p549_p4, %p689_p9  ;;  %p555_p10 = por %p554_p8, %p553_p7 }
  0x2a   : > { %304 = vperm.xlu0 %497, %v285_v2   ;;  %v225_v7 = vrot.slane %v224_v5, 4  ;;  %v218_v9 = vrot.slane %v217_v8, 4 }
  0x2b   : > { %p551_p6 = pneg %p550_p5 }
  0x2c   : > { %v226_v10 = vadd.f32 %v225_v7, %v224_v5  ;;  %v219_v11 = vadd.f32 %v218_v9, %v217_v8 }
  0x2d   : > { %p556_p13 = pnand %p555_p10, %p551_p6 }
  0x2e   : > { %v227_v12 = vrot.slane %v226_v10, 2  ;;  %v220_v13 = vrot.slane %v219_v11, 2 }
  0x30   : > { %v228_v14 = vadd.f32 %v227_v12, %v226_v10  ;;  %v221_v15 = vadd.f32 %v220_v13, %v219_v11 }
  0x32   : > { %v229_v16 = vrot.slane %v228_v14, 1  ;;  %v222_v17 = vrot.slane %v221_v15, 1 }
  0x34   : > { %v230_v18 = vadd.f32 %v229_v16, %v228_v14  ;;  %v223_v19 = vadd.f32 %v222_v17, %v221_v15 }
  0x36   : > { %v232_v20 = vmul.f32 0.25, %v230_v18  ;;  %v231_v21 = vmul.f32 0.25, %v223_v19 }
  0x38   : > { %v235_v22 = vrot.slane %v232_v20, 4 }
  0x3a   : > { %v236_v23 = vsel %vm216_vm0, %v231_v21, %v235_v22 }
  0x3b   : > { %v238_v24 = vsub.f32 %v209_v3, %v236_v23 }
  0x3d   : > { %v239_v25 = vmul.f32 %v238_v24, %v238_v24 }
  0x3f   : > { %241 = vst [vmem:[#allocation1] ss:$2 sm:$0xff] %v239_v25 }
  0x46   : > { %v243_v26 = vld.sshfl [vmem:[#allocation1 + $0x8] sm:$0xff pattern:$0x75316420]  ;;  %v242_v28 = vld.sshfl [vmem:[#allocation1] sm:$0xff pattern:$0x75316420] }
  0x47   : > { %v253_v27 = vsel %vm216_vm0, %v243_v26, 0.0  ;;  %v246_v30 = vsel %vm216_vm0, %v242_v28, 0.0 }
  0x48   : > { %v254_v29 = vrot.slane %v253_v27, 4  ;;  %v247_v31 = vrot.slane %v246_v30, 4 }
  0x4a   : > { %v255_v32 = vadd.f32 %v254_v29, %v253_v27  ;;  %v248_v33 = vadd.f32 %v247_v31, %v246_v30 }
  0x4c   : > { %v256_v34 = vrot.slane %v255_v32, 2  ;;  %v249_v35 = vrot.slane %v248_v33, 2 }
  0x4e   : > { %v257_v36 = vadd.f32 %v256_v34, %v255_v32  ;;  %v250_v37 = vadd.f32 %v249_v35, %v248_v33 }
  0x50   : > { %v258_v38 = vrot.slane %v257_v36, 1  ;;  %v251_v39 = vrot.slane %v250_v37, 1 }
  0x52   : > { %v259_v40 = vadd.f32 %v258_v38, %v257_v36  ;;  %v252_v41 = vadd.f32 %v251_v39, %v250_v37 }
  0x54   : > { %v261_v42 = vmul.f32 0.25, %v259_v40  ;;  %v260_v43 = vmul.f32 0.25, %v252_v41 }
  0x56   : > { %v263_v44 = vadd.f32 1e-05, %v261_v42  ;;  %v262_v45 = vadd.f32 1e-05, %v260_v43 }
  0x58   : > { %498 = vrsqrt.f32 %v263_v44  ;;  %vm280_vm1 = vweird.f32 %v263_v44  ;;  %vm270_vm4 = vweird.f32 %v262_v45 }
  0x59   : > { %500 = vrsqrt.f32 %v262_v45 }
  0x5e   : > { %v499_v46 = vpop.eup %498 }
  0x5f   : > { %v275_v47 = vmul.f32 %v499_v46, %v263_v44  ;;  %v501_v48 = vpop.eup %500  ;;  %vm281_vm2 = vweird.f32 %v499_v46 }
  0x60   : > { %v265_v49 = vmul.f32 %v501_v48, %v262_v45  ;;  %vm282_vm3 = vmor %vm280_vm1, %vm281_vm2  ;;  %vm271_vm5 = vweird.f32 %v501_v48 }
  0x61   : > { %v276_v50 = vmul.f32 %v499_v46, %v275_v47  ;;  %vm272_vm6 = vmor %vm270_vm4, %vm271_vm5 }
  0x62   : > { %v266_v51 = vmul.f32 %v501_v48, %v265_v49 }
  0x63   : > { %v277_v52 = vmul.f32 0.5, %v276_v50 }
  0x64   : > { %v267_v53 = vmul.f32 0.5, %v266_v51 }
  0x65   : > { %v278_v54 = vsub.f32 1.5, %v277_v52 }
  0x66   : > { %v268_v55 = vsub.f32 1.5, %v267_v53 }
  0x67   : > { %v279_v56 = vmul.f32 %v499_v46, %v278_v54 }
  0x68   : > { %v269_v57 = vmul.f32 %v501_v48, %v268_v55 }
  0x69   : > { %v283_v58 = vsel %vm282_vm3, %v499_v46, %v279_v56 }
  0x6a   : > { %v288_v61 = vrot.slane %v283_v58, 4  ;;  %v273_v62 = vsel %vm272_vm6, %v501_v48, %v269_v57 }
  0x6c   : > { %v289_v1 = vsel %vm216_vm0, %v273_v62, %v288_v61 }
  0x6d   : > { %v291_v2 = vmul.f32 %v289_v1, %v238_v24 }
  0x94   : > { %v295_v63 = vpop.permute.xlu0 %294 }
  0x95   : > { %v299_v3 = vperm.slane %v295_v63, %v298_v0 }
  0x97   : > { %v301_v5 = vmul.f32 %v299_v3, %v291_v2 }
  0x9c   : > { %v305_v4 = vpop.permute.xlu0 %304 }
  0x9d   : > { %v309_v6 = vperm.slane %v305_v4, %v298_v0 }
  0x9f   : > { %v311_v7 = vadd.f32 %v309_v6, %v301_v5 }
  0xa1   : > { %312 = vst [vmem:[%s206_s6] sm:$0xff] %v311_v7 }
  0xa2   : > { %559 = shalt.err (!%p556_p13)
}
  0xa3   : > { %435 = dma.vmem_to_hbm [thread:$0]  (%p689_p9), %s330_s7, 128, %s332_s8, %s314_s9  }
  0xa4 PF: > { %s343_s11 = sand.u32 1, %s594_s12   ;;  %p442_p0 = pnand %p419_p12, %p696_p11 }
  0xa5   : > { %s344_s28 = scalar_lea.sflag [#allocation4], %s343_s11 }
  0xa6   : > { %p443_p1 = pneg %p442_p0 }
  0xa8   : > { %589 = dma.done.wait (%p443_p1), %s344_s28, 128  }
  0xa9   : > { %591 = vsyncadd (%p443_p1), %s344_s28, 4294967168  ;;  %s19_s17 = sadd.s32 1, %s614_s17   ;;  %s782_s12 = smov %s598_s13 }
  0xaa   : > { %p16_p2 = scmp.ge.s32.totalorder %s19_s17, 4   ;;  %s783_s13 = smov %s602_s14 }
  0xab   : > { %s784_s14 = smov %s694_s26  ;;  %s785_s15 = smov %s610_s16 }
  0xac   : > { %s786_s16 = smov %s788_s20  ;;  %18 = sbr.rel (!%p16_p2) target bundleno = 6 (0x6), region = 77 }
  0xb1   :  { %350 = vsyncpa [#allocation3], 1 }
  0xb2   :  { %352 = vsyncpa [#allocation3 + $0x1], 1 }
  0xb3   :  { %353 = vsyncpa [#allocation4], 1 }
  0xb4   :  { %355 = vsyncpa [#allocation4 + $0x1], 1 }

</bundles_post_ra>
